<compile_context>
chip_gen: v7x
topology: tpu7x:2x2x1
jax: 0.10.0
libtpu: 0.0.40
codegen_flags: <defaults>
</compile_context>

<pallas_src>
import math
import jax
import jax.numpy as jnp
from jax import lax
from jax.experimental import pallas as pl
from jax.experimental.pallas import tpu as pltpu


def _round_up(x, m):
    return ((x + m - 1) // m) * m


def _round_down(x, m):
    return (x // m) * m


def _vmem_capacity_bytes():
    """Physical VMEM per core; conservative 64 MiB fallback (valid on all gens)."""
    try:
        return int(pltpu.get_tpu_info().vmem_capacity_bytes)
    except Exception:
        return 64 * 1024 * 1024


# ---------------- kernel 1: user embedding (mean over valid positions) -------

def user_eb_kernel(item_eb_ref, mask_ref, user_ref):
    # item_eb_ref : (TB, L, H)  gathered LI_emb embeddings for this batch tile
    # mask_ref    : (TB, L)     validity mask for this batch tile
    # user_ref    : (TB, H)     output user embedding tile
    item_eb = item_eb_ref[...]
    lengths = jnp.sum(mask_ref[...], axis=1, keepdims=True)      # (TB, 1)
    user_ref[...] = (jnp.sum(item_eb, axis=1) / lengths).astype(user_ref.dtype)


# ---------------- kernel 2: scores = user_eb @ item_emb.weight.T -------------

def scores_kernel(user_ref, item_w_ref, scores_ref):
    # user_ref   : (TB, H)   resident across the N-tile axis (index_map ignores j)
    # item_w_ref : (TN, H)   streamed weight tile (double-buffered by Pallas)
    # scores_ref : (TB, TN)  output scores tile (TN multiple of 128, or full N)
    # Contract dim 1 of BOTH operands (user @ weight.T), f32 accumulation.
    # TODO(synk): confirm via pl.lower_as_mlir that this lowers transpose-free;
    # if an XLU transpose of the weight tile appears, pre-transpose the table
    # once outside the kernel to (H, N) and tile (H, TN) instead.
    scores = lax.dot_general(
        user_ref[...], item_w_ref[...],
        dimension_numbers=(((1,), (1,)), ((), ())),
        preferred_element_type=jnp.float32)
    scores_ref[...] = scores.astype(scores_ref.dtype)


# ---------------- tile-size heuristics ---------------------------------------

def _pick_tn(N, H, wbytes, tb, vmem_cap):
    """Weight-tile width along N.

    Targets >= ~4 MiB of weight DMA per grid step (hides per-step overhead),
    keeps >= 2 N-tiles when N >= 256 (feeds both TensorCores on v7x), and fits
    the double-buffered working set into the per-generation VMEM budget.
    """
    if N <= 256:
        return N                                               # tiny table: 1 tile
    target = _round_up((4 << 20) // max(1, H * wbytes), 128)   # ~4 MiB / step
    half = _round_up(pl.cdiv(N, 2), 128)                       # >= 2 N-tiles
    per_tn = 2 * _round_up(H, 128) * wbytes + 2 * _round_up(tb, 8) * 4
    budget = vmem_cap - (8 << 20)                              # Mosaic headroom
    fit = max(128, _round_down(max(budget, per_tn * 128) // per_tn, 128))
    return max(128, min(target, half, fit))


# ---------------- forward wrapper ---------------------------------------------

def fpmc_forward(item_list, mask, li_emb_weight, item_emb_weight, *,
                 tn=None, tb=None, weights_dtype=jnp.bfloat16):
    """Pallas implementation of FPMC.forward -> (user_eb, scores)."""
    B, L = item_list.shape
    N, H = item_emb_weight.shape
    mask_f = mask.astype(jnp.float32)

    vmem_phys = _vmem_capacity_bytes()
    vmem_cap = (vmem_phys * 3) // 4          # leave headroom for Mosaic scratch
    headroom = 4 << 20

    # Glue: embedding gather (see TODO at top for in-kernel fusion).
    item_eb = jnp.take(li_emb_weight, item_list, axis=0)        # (B, L, H)

    # ---- kernel 1: user embedding, tiled over B ------------------------------
    per_row = (2 * _round_up(L, 8) * _round_up(H, 128) * 4      # item_eb (dbl buf)
               + 2 * _round_up(L, 128) * 4                      # mask    (dbl buf)
               + 2 * _round_up(H, 128) * 4)                     # output  (dbl buf)
    tb_u = max(1, min(B, (vmem_cap // 2 - headroom) // per_row))
    if tb_u < B:
        tb_u = max(8, _round_down(tb_u, 8))
    u_vmem = int(min(vmem_cap, max(tb_u * per_row + headroom, 16 << 20)))

    user_eb = pl.pallas_call(
        user_eb_kernel,
        out_shape=jax.ShapeDtypeStruct((B, H), jnp.float32),
        grid_spec=pltpu.PrefetchScalarGridSpec(
            num_scalar_prefetch=0,
            grid=(pl.cdiv(B, tb_u),),
            in_specs=[
                pl.BlockSpec((tb_u, L, H), lambda i: (i, 0, 0)),
                pl.BlockSpec((tb_u, L), lambda i: (i, 0)),
            ],
            out_specs=pl.BlockSpec((tb_u, H), lambda i: (i, 0)),
        ),
        compiler_params=pltpu.CompilerParams(
            dimension_semantics=("parallel",),
            vmem_limit_bytes=u_vmem),
    )(item_eb, mask_f)

    # ---- kernel 2: tiled scores matmul over (B, N) ---------------------------
    w = item_emb_weight.astype(weights_dtype)      # stream the table narrow
    u = user_eb.astype(weights_dtype)
    wbytes = jnp.dtype(weights_dtype).itemsize

    if tb is None:
        tb = B if B <= 256 else 256                # MXU-friendly M once compute-bound
    if tb < B:
        tb = max(8, _round_down(tb, 8))
    if tn is None:
        tn = _pick_tn(N, H, wbytes, tb, vmem_cap)

    grid_b = pl.cdiv(B, tb)
    grid_n = pl.cdiv(N, tn)

    need = (2 * tn * _round_up(H, 128) * wbytes                   # weight tiles
            + 2 * _round_up(tb, 8) * _round_up(tn, 128) * 4       # output tiles
            + 2 * _round_up(tb, 8) * _round_up(H, 128) * wbytes)  # user tile
    s_vmem = int(min(vmem_cap, max(need + headroom, 16 << 20)))

    cost = pl.CostEstimate(
        flops=2 * B * N * H,
        transcendentals=0,
        bytes_accessed=N * H * wbytes + B * N * 4 + B * H * wbytes)

    scores = pl.pallas_call(
        scores_kernel,
        out_shape=jax.ShapeDtypeStruct((B, N), jnp.float32),
        grid_spec=pltpu.PrefetchScalarGridSpec(
            num_scalar_prefetch=0,
            grid=(grid_b, grid_n),                 # N innermost: weight stream locality
            in_specs=[
                pl.BlockSpec((tb, H), lambda i, j: (i, 0)),   # user_eb: resident per i
                pl.BlockSpec((tn, H), lambda i, j: (j, 0)),   # weights: streamed
            ],
            out_specs=pl.BlockSpec((tb, tn), lambda i, j: (i, j)),
        ),
        compiler_params=pltpu.CompilerParams(
            dimension_semantics=("parallel", "parallel"),     # v7x: split across TCs
            vmem_limit_bytes=s_vmem),
        cost_estimate=cost,
    )(u, w)

    return user_eb, scores


def init_fpmc_params(key, item_num, hidden_size):
    """Deterministic xavier_normal_-style init matching FPMC._init_weights."""
    k1, k2 = jax.random.split(key)
    std = math.sqrt(2.0 / (item_num + hidden_size))
    li_emb = std * jax.random.normal(k1, (item_num, hidden_size), jnp.float32)
    li_emb = li_emb.at[0].set(0.0)                 # padding_idx=0 row zeroed
    item_emb = std * jax.random.normal(k2, (item_num, hidden_size), jnp.float32)
    return li_emb, item_emb


if __name__ == "__main__":
    item_num = 64
    hidden_size = 32
    batch = 4
    seq_len = 8

    key = jax.random.PRNGKey(0)
    kp, ki, km = jax.random.split(key, 3)

    li_emb_weight, item_emb_weight = init_fpmc_params(kp, item_num, hidden_size)

    # item indices in [0, item_num); 0 acts as padding
    item_list = jax.random.randint(ki, (batch, seq_len), 0, item_num, dtype=jnp.int32)
    # mask: 1.0 for valid positions, ensure at least 1 valid per row
    mask = (jax.random.uniform(km, (batch, seq_len)) > 0.3).astype(jnp.float32)
    mask = mask.at[:, 0].set(1.0)
    # zero out masked-off items to mimic padding behavior
    item_list = item_list * mask.astype(jnp.int32)

    user_eb, scores = fpmc_forward(item_list, mask, li_emb_weight, item_emb_weight)
    jax.block_until_ready((user_eb, scores))

    # Pure-JAX reference.
    item_eb_ref = jnp.take(li_emb_weight, item_list, axis=0)
    lengths_ref = jnp.reshape(jnp.sum(mask, axis=1), (batch, 1))
    user_ref = jnp.sum(item_eb_ref, axis=1) / lengths_ref
    scores_ref = user_ref @ item_emb_weight.T

    assert jnp.allclose(user_eb, user_ref, atol=1e-5), "user_eb mismatch"
    # Default path streams weights in bf16 -> looser tolerance on scores.
    assert jnp.allclose(scores, scores_ref, atol=1e-2, rtol=1e-2), "scores (bf16) mismatch"

    # Full-precision weight-streaming path, tight tolerance.
    _, scores_f32 = fpmc_forward(item_list, mask, li_emb_weight, item_emb_weight,
                                 weights_dtype=jnp.float32)
    jax.block_until_ready(scores_f32)
    assert jnp.allclose(scores_f32, scores_ref, atol=1e-4), "scores (f32) mismatch"

    print("KERNEL_OK")
</pallas_src>

<mosaic_0001>
module attributes {stable_mosaic.version = 11 : i64} {
  func.func @user_eb_kernel(%arg0: i32, %arg1: memref<4x8x32xf32, #tpu.memory_space<vmem>>, %arg2: memref<4x8xf32, #tpu.memory_space<vmem>>, %arg3: memref<4x32xf32, #tpu.memory_space<vmem>>) attributes {dimension_semantics = [#tpu.dimension_semantics<parallel>], iteration_bounds = array<i64: 1>, scalar_prefetch = 0 : i64, scratch_operands = 0 : i64, tpu.core_type = #tpu.core_type<tc>, window_params = [{transform_indices = @transform_0, window_bounds = array<i64: 4, 8, 32>}, {transform_indices = @transform_1, window_bounds = array<i64: 4, 8>}, {transform_indices = @transform_2, window_bounds = array<i64: 4, 32>}]} {
    %c0 = arith.constant 0 : index
    %c0_0 = arith.constant 0 : index
    %c0_1 = arith.constant 0 : index
    %0 = vector.load %arg1[%c0, %c0_0, %c0_1] : memref<4x8x32xf32, #tpu.memory_space<vmem>>, vector<4x8x32xf32>
    %c0_2 = arith.constant 0 : index
    %c0_3 = arith.constant 0 : index
    %1 = vector.load %arg2[%c0_2, %c0_3] : memref<4x8xf32, #tpu.memory_space<vmem>>, vector<4x8xf32>
    %cst = arith.constant dense<0.000000e+00> : vector<4xf32>
    %2 = vector.multi_reduction <add>, %1, %cst [1] : vector<4x8xf32> to vector<4xf32>
    %3 = vector.shape_cast %2 : vector<4xf32> to vector<4x1xf32>
    %cst_4 = arith.constant dense<0.000000e+00> : vector<4x32xf32>
    %4 = vector.multi_reduction <add>, %0, %cst_4 [1] : vector<4x8x32xf32> to vector<4x32xf32>
    %5 = vector.broadcast %3 : vector<4x1xf32> to vector<4x32xf32>
    %6 = arith.divf %4, %5 : vector<4x32xf32>
    %c0_5 = arith.constant 0 : index
    %c0_6 = arith.constant 0 : index
    %7 = vector.load %arg3[%c0_5, %c0_6] : memref<4x32xf32, #tpu.memory_space<vmem>>, vector<4x32xf32>
    tpu.vector_store %arg3[%c0_5, %c0_6], %6 {strides = array<i32>} : memref<4x32xf32, #tpu.memory_space<vmem>>, vector<4x32xf32>,
    return
  }
  func.func @transform_0(%arg0: i32) -> (i32, i32, i32) {
    %c0_i32 = arith.constant 0 : i32
    %c0_i32_0 = arith.constant 0 : i32
    %c0_i32_1 = arith.constant 0 : i32
    return %arg0, %c0_i32, %c0_i32_0 : i32, i32, i32
  }
  func.func @transform_1(%arg0: i32) -> (i32, i32) {
    %c0_i32 = arith.constant 0 : i32
    %c0_i32_0 = arith.constant 0 : i32
    return %arg0, %c0_i32 : i32, i32
  }
  func.func @transform_2(%arg0: i32) -> (i32, i32) {
    %c0_i32 = arith.constant 0 : i32
    %c0_i32_0 = arith.constant 0 : i32
    return %arg0, %c0_i32 : i32, i32
  }
}

</mosaic_0001>

<bundles_post_ra>
// kernel: tpu_custom_call.1
= control target key start
LH: loop header
LB: loop body
LE: loop exit
PB: predicated region body
PF: predicated region fallthrough
CT: control target
= control target key end

     0   :  { %7 = vsyncpa [#allocation3], 0  ;;  %s265_s0 = inlined_call_operand.hbm [shape: f32[4,8,32], index: 0, kind: input, shape index: {}]   ;;  %s266_s1 = inlined_call_operand.hbm [shape: f32[4,8], index: 1, kind: input, shape index: {}]   ;;  %s267_s2 = inlined_call_operand.hbm [shape: f32[4,32], index: 2, kind: output, shape index: {}]  }
   0x1   :  { %8 = vsyncpa [#allocation6], 0 }
   0x2   :  { %9 = vsyncpa [#allocation4], 0  ;;  %s209_s9 = smov [#allocation2]   ;;  %s137_s13 = scalar_lea.hbm %s265_s0, 512 }
   0x3   :  { %s15_s10 = sshll.u32 %s209_s9, 4  ;;  %p138_p0 = scmp.ne.s32.totalorder %s265_s0, %s137_s13  ;;  %s16_s10 = int_to_ptr.vmem [resolvable:$true] %s15_s10 }
   0x4   :  { %p141_p1 = scmp.lt.u32.totalorder %s137_s13, %s265_s0 }
   0x6   :  { %p143_p2 = pnand %p141_p1, %p138_p0 }
   0x8   :  { %146 = shalt.err (!%p143_p2)
}
   0x9   :  { %s147_s18 = scalar_lea.vmem %s16_s10, 512  ;;  %p152_p4 = scmp.lt.s32.totalorder %s16_s10, %s16_s10 }
   0xa   :  { %p148_p3 = scmp.ne.s32.totalorder %s16_s10, %s147_s18  ;;  %p153_p5 = scmp.lt.s32.totalorder %s147_s18, %s147_s18 }
   0xc   :  { %p154_p6 = por %p153_p5, %p152_p4 }
   0xe   :  { %p155_p7 = pnand %p154_p6, %p148_p3 }
  0x10   :  { %158 = shalt.err (!%p155_p7)
}
  0x11   :  { %s210_s19 = smov 128   ;;  %s211_s20 = smov 8  }
  0x12   :  { %21 = dma.hbm_to_vmem [thread:$0]  %s265_s0, 512, %s16_s10, [#allocation3], %s210_s19, %s210_s19, %s211_s20  }
  0x13   :  { %s212_s23 = smov [#allocation5]   ;;  %s159_s27 = scalar_lea.hbm %s266_s1, 64 }
  0x14   :  { %s28_s24 = sshll.u32 %s212_s23, 4  ;;  %p160_p8 = scmp.ne.s32.totalorder %s266_s1, %s159_s27  ;;  %s29_s24 = int_to_ptr.vmem [resolvable:$true] %s28_s24 }
  0x15   :  { %p163_p9 = scmp.lt.u32.totalorder %s159_s27, %s266_s1 }
  0x17   :  { %p165_p10 = pnand %p163_p9, %p160_p8 }
  0x19   :  { %168 = shalt.err (!%p165_p10)
}
  0x1a   :  { %s169_s4 = scalar_lea.vmem %s29_s24, 64  ;;  %p174_p12 = scmp.lt.s32.totalorder %s29_s24, %s29_s24 }
  0x1b   :  { %p170_p11 = scmp.ne.s32.totalorder %s29_s24, %s169_s4  ;;  %p175_p13 = scmp.lt.s32.totalorder %s169_s4, %s169_s4 }
  0x1d   :  { %p176_p0 = por %p175_p13, %p174_p12 }
  0x1f   :  { %p177_p1 = pnand %p176_p0, %p170_p11 }
  0x21   :  { %180 = shalt.err (!%p177_p1)
}
  0x22   :  { %31 = dma.hbm_to_vmem [thread:$0]  %s266_s1, 64, %s29_s24, [#allocation6]  }
  0x23   :  { %203 = dma.done.wait [#allocation3], 512  }
  0x24   :  { %204 = vsyncadd [#allocation3], 4294966784 }
  0x25   :  { %205 = dma.done.wait [#allocation6], 64  }
  0x26   :  { %206 = vsyncadd [#allocation6], 4294967232  ;;  %vm43_vm0 = vcmask 60416   ;;  %v42_v0 = vld [vmem:[#allocation5] sm:$0xf]  ;;  %v39_v2 = vld [vmem:[#allocation2 + $0x8] sm:$0xff] }
  0x27   :  { %v44_v1 = vsel %vm43_vm0, %v42_v0, 0.0  ;;  %v40_v3 = vld [vmem:[#allocation2 + $0x10] sm:$0xff]  ;;  %v38_v4 = vld [vmem:[#allocation2] sm:$0xff]  ;;  %v41_v5 = vld [vmem:[#allocation2 + $0x18] sm:$0xff]  ;;  %vm47_vm1 = vcmask 261120   ;;  %vm97_vm2 = vcmask 1041409  }
  0x28   :  { %45 = vadd.xlane.f32.xlu0 %v44_v1  ;;  %v55_v6 = vsel %vm47_vm1, %v39_v2, 0.0  ;;  %v62_v7 = vsel %vm47_vm1, %v40_v3, 0.0  ;;  %v48_v8 = vsel %vm47_vm1, %v38_v4, 0.0  ;;  %v69_v9 = vsel %vm47_vm1, %v41_v5, 0.0  ;;  %s213_s1 = smov [#allocation7]  }
  0x29   :  { %v56_v10 = vrot.slane %v55_v6, 4  ;;  %v63_v11 = vrot.slane %v62_v7, 4  ;;  %v49_v12 = vrot.slane %v48_v8, 4  ;;  %v70_v13 = vrot.slane %v69_v9, 4  ;;  %s114_s6 = sshll.u32 %s213_s1, 4  ;;  %s115_s6 = int_to_ptr.vmem [resolvable:$true] %s114_s6 }
  0x2a   :  { %vm100_vm3 = vcmask 1042434   ;;  %vm103_vm4 = vcmask 1043459   ;;  %vm106_vm5 = vcmask 257024   ;;  %s181_s7 = scalar_lea.vmem %s115_s6, 64  ;;  %p186_p3 = scmp.lt.s32.totalorder %s115_s6, %s115_s6 }
  0x2b   :  { %v57_v14 = vadd.f32 %v56_v10, %v55_v6  ;;  %v64_v15 = vadd.f32 %v63_v11, %v62_v7  ;;  %v50_v16 = vadd.f32 %v49_v12, %v48_v8  ;;  %v71_v17 = vadd.f32 %v70_v13, %v69_v9  ;;  %p182_p2 = scmp.ne.s32.totalorder %s115_s6, %s181_s7  ;;  %p187_p4 = scmp.lt.s32.totalorder %s181_s7, %s181_s7 }
  0x2d   :  { %v58_v18 = vrot.slane %v57_v14, 2  ;;  %v65_v19 = vrot.slane %v64_v15, 2  ;;  %v51_v21 = vrot.slane %v50_v16, 2  ;;  %v72_v22 = vrot.slane %v71_v17, 2  ;;  %p188_p5 = por %p187_p4, %p186_p3 }
  0x2f   :  { %v59_v26 = vadd.f32 %v58_v18, %v57_v14  ;;  %v66_v27 = vadd.f32 %v65_v19, %v64_v15  ;;  %v52_v28 = vadd.f32 %v51_v21, %v50_v16  ;;  %v73_v29 = vadd.f32 %v72_v22, %v71_v17  ;;  %p189_p6 = pnand %p188_p5, %p182_p2 }
  0x31   :  { %v60_v30 = vrot.slane %v59_v26, 1  ;;  %v67_v31 = vrot.slane %v66_v27, 1  ;;  %v53_v32 = vrot.slane %v52_v28, 1  ;;  %v74_v33 = vrot.slane %v73_v29, 1 }
  0x33   :  { %v61_v34 = vadd.f32 %v60_v30, %v59_v26  ;;  %v68_v35 = vadd.f32 %v67_v31, %v66_v27  ;;  %v54_v37 = vadd.f32 %v53_v32, %v52_v28  ;;  %v75_v38 = vadd.f32 %v74_v33, %v73_v29 }
  0xb5   :  { %v46_v20 = vpop.xlane.xlu0 %45 }
  0xb6   :  { %v77_v23 = vrot.slane %v46_v20, 1  ;;  %v78_v24 = vrot.slane %v46_v20, 2  ;;  %v79_v25 = vrot.slane %v46_v20, 3  ;;  %129 = vrcp.f32 %v46_v20 }
  0xb8   :  { %131 = vrcp.f32 %v77_v23 }
  0xb9   :  { %133 = vrcp.f32 %v78_v24 }
  0xba   :  { %135 = vrcp.f32 %v79_v25 }
  0xc0   :  { %v130_v36 = vpop.eup %129 }
  0xc1   :  { %v85_v44 = vmul.f32 %v130_v36, %v54_v37 }
  0xc2   :  { %v132_v39 = vpop.eup %131 }
  0xc3   :  { %v134_v40 = vpop.eup %133  ;;  %v87_v41 = vmul.f32 %v132_v39, %v61_v34 }
  0xc4   :  { %v136_v42 = vpop.eup %135  ;;  %v89_v43 = vmul.f32 %v134_v40, %v68_v35 }
  0xc5   :  { %v91_v45 = vmul.f32 %v136_v42, %v75_v38  ;;  %v96_v46 = vrot.slane %v87_v41, 7 }
  0xc6   :  { %v99_v47 = vrot.slane %v89_v43, 6 }
  0xc7   :  { %v98_v48 = vsel %vm97_vm2, %v96_v46, %v85_v44  ;;  %v102_v49 = vrot.slane %v91_v45, 5 }
  0xc8   :  { %v101_v50 = vsel %vm100_vm3, %v99_v47, %v98_v48 }
  0xc9   :  { %v104_v51 = vsel %vm103_vm4, %v102_v49, %v101_v50 }
  0xca   :  { %107 = vst.msk [vmem:[#allocation7] sm:$0xf] %vm106_vm5, %v104_v51 }
  0xcb   :  { %192 = shalt.err (!%p189_p6)
}
  0xcc   :  { %s193_s10 = scalar_lea.hbm %s267_s2, 64 }
  0xcd   :  { %p194_p7 = scmp.ne.s32.totalorder %s267_s2, %s193_s10  ;;  %p197_p8 = scmp.lt.u32.totalorder %s193_s10, %s267_s2 }
  0xcf   :  { %p199_p9 = pnand %p197_p8, %p194_p7 }
  0xd1   :  { %202 = shalt.err (!%p199_p9)
}
  0xd2   :  { %117 = dma.vmem_to_hbm [thread:$0]  %s115_s6, 64, %s267_s2, [#allocation4]  }
  0xd3   :  { %207 = dma.done.wait [#allocation4], 64  }
  0xd4   :  { %208 = vsyncadd [#allocation4], 4294967232 }
  0xd5   :  { %121 = vsyncpa [#allocation3], 1 }
  0xd6   :  { %122 = vsyncpa [#allocation6], 1 }
  0xd7   :  { %123 = vsyncpa [#allocation4], 1 }

</bundles_post_ra>
